<compile_context>
chip_gen: v6e
topology: v6e:2x2x1
jax: 0.10.0
libtpu: 0.0.40
codegen_flags: <defaults>
</compile_context>

<pallas_src>
import jax
import jax.numpy as jnp
from jax.experimental import pallas as pl
from jax.experimental.pallas import tpu as pltpu


def _cross_embeddings_kernel(x_ref, pos_ref, o_ref):
    # x_ref  : (Bt, Ct) activation tile
    # pos_ref: (1,  Ct) position-embedding tile (broadcast over batch rows)
    # o_ref  : (Bt, Ct)
    # Add in f32 (free on the VPU for this HBM-bound op), store in the
    # activation dtype.
    x = x_ref[...].astype(jnp.float32)
    p = pos_ref[...].astype(jnp.float32)
    o_ref[...] = (x + p).astype(o_ref.dtype)


def _chip_info():
    """(tile_budget_bytes, num_tensorcores, scoped_vmem_default, physical_vmem)."""
    try:
        kind = jax.devices()[0].device_kind.lower()
    except Exception:  # pragma: no cover - defensive
        kind = ""
    mib = 1024 * 1024
    if "v7" in kind:   # v7x: 32 MiB scoped default, 64 MiB physical, 2 TCs/chip
        return 5 * mib, 2, 32 * mib, 64 * mib
    if "v6" in kind:   # v6e: 32 MiB scoped default, 128 MiB physical, 1 TC
        return 5 * mib, 1, 32 * mib, 128 * mib
    if "v5" in kind:   # v5e/v5p: 16 MiB scoped default is the safe assumption
        return int(2.5 * mib), 1, 16 * mib, 128 * mib
    # Unknown part: conservative everywhere.
    return 2 * mib, 1, 16 * mib, 64 * mib


def _divisors(n):
    ds = []
    i = 1
    while i * i <= n:
        if n % i == 0:
            ds.append(i)
            if i != n // i:
                ds.append(n // i)
        i += 1
    return ds


def _choose_tiles(batch, flat, itemsize, *, target_tile_bytes, num_cores,
                  min_split_tile_bytes=512 * 1024):
    """Pick (Bt, Ct): batch rows and lane-dense flattened columns per step.

    Legal tiles obey the Mosaic block constraints (second-minor: multiple of 8
    or full extent; minor: multiple of 128 or full extent).  Preference:
      1. tiles that fit the per-generation VMEM budget,
      2. (multi-core parts only) enough steps for every core *and* each step
         still a non-trivial slab,
      3. largest tile (amortize ~0.35 us/step overhead, reach HBM roofline),
      4. more batch rows per step (less per-step pos broadcast work),
      5. wider column tile (pos stays resident longer).
    If nothing fits the budget, fall back to the SMALLEST legal tile.
    """
    bt_opts = {d for d in _divisors(batch) if d % 8 == 0}
    bt_opts.add(batch)

    if flat % 128 == 0:
        ct_opts = {128 * d for d in _divisors(flat // 128)}
    else:
        ct_opts = set()
    ct_opts.add(flat)

    combos = [(bt, ct) for bt in bt_opts for ct in ct_opts]

    def key(opt):
        bt, ct = opt
        tile_bytes = bt * ct * itemsize
        steps = (batch // bt) * (flat // ct)
        fits = tile_bytes <= target_tile_bytes
        if fits:
            split_ok = (num_cores > 1 and steps >= num_cores
                        and tile_bytes >= min_split_tile_bytes)
            return (1, int(split_ok), tile_bytes, bt, ct)
        # Nothing-fits fallback branch: smallest legal tile wins.
        return (0, 0, -tile_bytes, bt, ct)

    return max(combos, key=key)


def cross_embeddings(concat_embeddings, position_embedding_table):
    """Pallas equivalent of CrossEmbeddings.forward (eval mode).

    concat_embeddings:        [B, S, H]
    position_embedding_table: [max_position_embeddings, H]
    returns:                  [B, S, H]  (activation dtype)
    """
    B, S, H = concat_embeddings.shape
    max_pos, table_h = position_embedding_table.shape
    if S > max_pos:
        raise ValueError(
            f"sequence length {S} exceeds max_position_embeddings {max_pos}")
    if table_h != H:
        raise ValueError(f"hidden size mismatch: {H} vs table {table_h}")

    out_dtype = concat_embeddings.dtype
    itemsize = jnp.dtype(out_dtype).itemsize
    F = S * H

    budget, num_cores, scoped_default, physical_vmem = _chip_info()
    Bt, Ct = _choose_tiles(B, F, itemsize,
                           target_tile_bytes=budget, num_cores=num_cores)

    # Column axis OUTER, batch axis INNER: the pos block index (0, j) is
    # constant across the whole inner batch loop, so Pallas fetches the pos
    # tile once per column block instead of once per grid step.
    grid = (F // Ct, B // Bt)

    # Lane-dense 2D views; table cast to the activation dtype in the wrapper
    # (halves its read traffic for bf16 activations and keeps output dtype ==
    # activation dtype so HBM writes aren't upcast).
    x2d = concat_embeddings.reshape(B, F)
    pos2d = position_embedding_table[:S, :].astype(out_dtype).reshape(1, F)

    cost = pl.CostEstimate(
        flops=B * F,
        transcendentals=0,
        bytes_accessed=(2 * B * F + F) * itemsize,
    )

    # Double-buffered pipeline footprint: 2*in + 2*out + 2*pos tiles.  Only
    # raise the scoped-VMEM limit when the chosen tiles actually need it,
    # and always stay under the part's physical VMEM.
    footprint = 4 * Bt * Ct * itemsize + 2 * Ct * itemsize
    vmem_limit = None
    if footprint > int(0.9 * scoped_default):
        vmem_limit = min(int(footprint * 1.25) + (1 << 20),
                         physical_vmem - (4 << 20))

    out2d = pl.pallas_call(
        _cross_embeddings_kernel,
        out_shape=jax.ShapeDtypeStruct((B, F), out_dtype),
        grid_spec=pltpu.PrefetchScalarGridSpec(
            num_scalar_prefetch=0,
            grid=grid,
            in_specs=[
                pl.BlockSpec((Bt, Ct), lambda j, i: (i, j)),
                pl.BlockSpec((1, Ct), lambda j, i: (0, j)),
            ],
            out_specs=pl.BlockSpec((Bt, Ct), lambda j, i: (i, j)),
        ),
        compiler_params=pltpu.CompilerParams(
            dimension_semantics=("parallel", "parallel"),
            vmem_limit_bytes=vmem_limit),
        input_output_aliases={0: 0},
        cost_estimate=cost,
    )(x2d, pos2d)

    return out2d.reshape(B, S, H)


if __name__ == "__main__":
    # Config analogue: max_position_embeddings=128, hidden_size=32
    B, S, H = 2, 8, 32
    MAX_POS = 128

    key = jax.random.PRNGKey(0)
    k_x, k_pos = jax.random.split(key)

    concat_embeddings = jax.random.normal(k_x, (B, S, H), dtype=jnp.float32)
    # Deterministic synthetic parameter init (nn.Embedding weight shape).
    position_embedding_table = (
        0.02 * jax.random.normal(k_pos, (MAX_POS, H), dtype=jnp.float32)
    )

    # References computed before the kernel calls (the kernel output may alias
    # the activation HBM buffer via input_output_aliases).
    ref = concat_embeddings + position_embedding_table[:S, :][None, :, :]

    out = cross_embeddings(concat_embeddings, position_embedding_table)
    out = jax.block_until_ready(out)

    assert out.shape == (B, S, H)
    assert out.dtype == concat_embeddings.dtype
    assert jnp.allclose(out, ref, atol=1e-6), "f32 mismatch vs reference"

    # Mixed-dtype path: bf16 activations + f32 table -> bf16 output (table is
    # cast to bf16 in the wrapper; the add itself runs in f32 in the kernel).
    x_bf16 = concat_embeddings.astype(jnp.bfloat16)
    pos_bf16 = position_embedding_table[:S, :].astype(jnp.bfloat16)
    ref_bf16 = (x_bf16.astype(jnp.float32)
                + pos_bf16.astype(jnp.float32)[None, :, :]
                ).astype(jnp.bfloat16)

    out_bf16 = cross_embeddings(x_bf16, position_embedding_table)
    out_bf16 = jax.block_until_ready(out_bf16)

    assert out_bf16.shape == (B, S, H)
    assert out_bf16.dtype == jnp.bfloat16
    assert jnp.allclose(out_bf16.astype(jnp.float32),
                        ref_bf16.astype(jnp.float32),
                        atol=1e-2), "bf16 mismatch vs reference"

    print("KERNEL_OK")
</pallas_src>

<mosaic_0001>
module attributes {stable_mosaic.version = 11 : i64} {
  func.func @_cross_embeddings_kernel(%arg0: i32, %arg1: i32, %arg2: memref<2x256xf32, #tpu.memory_space<vmem>>, %arg3: memref<1x256xf32, #tpu.memory_space<vmem>>, %arg4: memref<2x256xf32, #tpu.memory_space<vmem>>) attributes {dimension_semantics = [#tpu.dimension_semantics<parallel>, #tpu.dimension_semantics<parallel>], iteration_bounds = array<i64: 1, 1>, scalar_prefetch = 0 : i64, scratch_operands = 0 : i64, tpu.core_type = #tpu.core_type<tc>, window_params = [{transform_indices = @transform_0, window_bounds = array<i64: 2, 256>}, {transform_indices = @transform_1, window_bounds = array<i64: 1, 256>}, {transform_indices = @transform_2, window_bounds = array<i64: 2, 256>}]} {
    %c0 = arith.constant 0 : index
    %c0_0 = arith.constant 0 : index
    %0 = vector.load %arg2[%c0, %c0_0] : memref<2x256xf32, #tpu.memory_space<vmem>>, vector<2x256xf32>
    %c0_1 = arith.constant 0 : index
    %c0_2 = arith.constant 0 : index
    %1 = vector.load %arg3[%c0_1, %c0_2] : memref<1x256xf32, #tpu.memory_space<vmem>>, vector<1x256xf32>
    %2 = vector.broadcast %1 : vector<1x256xf32> to vector<2x256xf32>
    %3 = arith.addf %0, %2 : vector<2x256xf32>
    %c0_3 = arith.constant 0 : index
    %c0_4 = arith.constant 0 : index
    %4 = vector.load %arg4[%c0_3, %c0_4] : memref<2x256xf32, #tpu.memory_space<vmem>>, vector<2x256xf32>
    tpu.vector_store %arg4[%c0_3, %c0_4], %3 {strides = array<i32>} : memref<2x256xf32, #tpu.memory_space<vmem>>, vector<2x256xf32>,
    return
  }
  func.func @transform_0(%arg0: i32, %arg1: i32) -> (i32, i32) {
    %c0_i32 = arith.constant 0 : i32
    return %arg1, %arg0 : i32, i32
  }
  func.func @transform_1(%arg0: i32, %arg1: i32) -> (i32, i32) {
    %c0_i32 = arith.constant 0 : i32
    %c0_i32_0 = arith.constant 0 : i32
    return %c0_i32, %arg0 : i32, i32
  }
  func.func @transform_2(%arg0: i32, %arg1: i32) -> (i32, i32) {
    %c0_i32 = arith.constant 0 : i32
    return %arg1, %arg0 : i32, i32
  }
}

</mosaic_0001>

<bundles_post_ra>
// kernel: tpu_custom_call.1
= control target key start
LH: loop header
LB: loop body
LE: loop exit
PB: predicated region body
PF: predicated region fallthrough
CT: control target
= control target key end

     0   :  { %7 = vsyncpa [#allocation3], 0  ;;  %s135_s0 = inlined_call_operand.hbm [shape: f32[2,256], index: 0, kind: input, shape index: {}, may-alias: {0,2}]   ;;  %s136_s1 = inlined_call_operand.vmem [shape: f32[1,256], index: 1, kind: input, shape index: {}]   ;;  %s137_s2 = inlined_call_operand.hbm [shape: f32[2,256], index: 2, kind: output, shape index: {}, may-alias: {0,2}]  }
   0x1   :  { %8 = vsyncpa [#allocation4], 0  ;;  %s108_s9 = smov [#allocation2]  }
   0x2   :  { %s15_s10 = sshll.u32 %s108_s9, 4  ;;  %s16_s10 = int_to_ptr.vmem [resolvable:$true] %s15_s10 }
   0x3   :  { %s72_s11 = scalar_lea.vmem %s16_s10, 64  ;;  %p77_p1 = scmp.lt.s32.totalorder %s16_s10, %s16_s10 }
   0x4   :  { %p73_p0 = scmp.ne.s32.totalorder %s16_s10, %s72_s11  ;;  %p78_p2 = scmp.lt.s32.totalorder %s72_s11, %s72_s11 }
   0x6   :  { %p79_p3 = por %p78_p2, %p77_p1 }
   0x8   :  { %p80_p4 = pnand %p79_p3, %p73_p0 }
   0xa   :  { %83 = shalt.err (!%p80_p4)
}
   0xb   :  { %18 = dma.hbm_to_vmem [thread:$0]  %s135_s0, 64, %s16_s10, [#allocation3]  }
   0xc   :  { %104 = dma.done.wait [#allocation3], 64  }
   0xd   :  { %105 = vsyncadd [#allocation3], 4294967232  ;;  %v27_v0 = vlaneseq  ;;  %v109_v1 = vmov 1983009808   ;;  %v25_v7 = vld [vmem:[%s136_s1] sm:$0x3] }
   0xe   :  { %v37_v2 = vunpack.c.l.s4 %v109_v1  ;;  %v24_v12 = vld [vmem:[#allocation2] sm:$0xf]  ;;  %s110_s16 = smov [#allocation5]  }
   0xf   :  { %v28_v3 = vshrl.u32 %v27_v0, 7  ;;  %s52_s0 = sshll.u32 %s110_s16, 4  ;;  %s53_s0 = int_to_ptr.vmem [resolvable:$true] %s52_s0 }
  0x10   :  { %v38_v6 = vunpack.c.0.s8 %v37_v2  ;;  %s84_s17 = scalar_lea.vmem %s53_s0, 64  ;;  %p89_p6 = scmp.lt.s32.totalorder %s53_s0, %s53_s0 }
  0x11   :  { %v29_v4 = vsub.s32 0, %v28_v3  ;;  %v33_v5 = vsub.s32 1, %v28_v3  ;;  %p85_p5 = scmp.ne.s32.totalorder %s53_s0, %s84_s17  ;;  %p90_p7 = scmp.lt.s32.totalorder %s84_s17, %s84_s17 }
  0x12   :  { %v41_v10 = vsub.s32 %v38_v6, %v28_v3 }
  0x13   :  { %v30_v8 = vrot.slane %v25_v7, %v29_v4  ;;  %v34_v9 = vrot.slane %v25_v7, %v33_v5  ;;  %p91_p8 = por %p90_p7, %p89_p6 }
  0x15   :  { %v35_v11 = vcombine.low %v30_v8, %v34_v9  ;;  %p92_p9 = pnand %p91_p8, %p85_p5 }
  0x17   :  { %v42_v13 = vrot.slane %v35_v11, %v41_v10 }
  0x19   :  { %v44_v14 = vadd.f32 %v42_v13, %v24_v12 }
  0x1b   :  { %45 = vst [vmem:[#allocation5] sm:$0xf] %v44_v14 }
  0x1c   :  { %95 = shalt.err (!%p92_p9)
}
  0x1d   :  { %55 = dma.vmem_to_hbm [thread:$0]  %s53_s0, 64, %s137_s2, [#allocation4]  }
  0x1e   :  { %106 = dma.done.wait [#allocation4], 64  }
  0x1f   :  { %107 = vsyncadd [#allocation4], 4294967232 }
  0x20   :  { %59 = vsyncpa [#allocation3], 1 }
  0x21   :  { %60 = vsyncpa [#allocation4], 1 }

</bundles_post_ra>
